<compile_context>
chip_gen: v7x
topology: tpu7x:2x2x1
jax: 0.10.0
libtpu: 0.0.40
codegen_flags: <defaults>
</compile_context>

<pallas_src>
import functools

import jax
import jax.numpy as jnp
from jax.experimental import pallas as pl
from jax.experimental.pallas import tpu as pltpu


# Packed-parameter slab row layout (lane dim padded to a multiple of 128).
_ROW_B1 = 0      # b1    [fc1]
_ROW_GAMMA = 1   # gamma [fc1]
_ROW_BETA = 2    # beta  [fc1]
_ROW_B2 = 3      # b2    [fc2]
_ROW_W3 = 4      # w3 row [fc2]  (Linear(fc2, 1) weight)
_ROW_B3 = 5      # b3 scalar in column 0
_PACK_ROWS = 8   # pad sublane dim to the native (8, 128) tile


def _critic_kernel(state_ref, action_ref, w1_ref, w2h_ref, w2a_ref, pp_ref,
                   out_ref, *, fc1, fc2):
    state = state_ref[...]          # [B, S]
    action = action_ref[...]        # [B, A]
    pp = pp_ref[...]                # [8, lane]  packed small params

    b1 = pp[_ROW_B1:_ROW_B1 + 1, :fc1]        # [1, fc1]
    gamma = pp[_ROW_GAMMA:_ROW_GAMMA + 1, :fc1]
    beta = pp[_ROW_BETA:_ROW_BETA + 1, :fc1]
    b2 = pp[_ROW_B2:_ROW_B2 + 1, :fc2]        # [1, fc2]
    w3_row = pp[_ROW_W3:_ROW_W3 + 1, :fc2]    # [1, fc2]
    b3 = pp[_ROW_B3:_ROW_B3 + 1, 0:1]         # [1, 1]

    # ---- Linear(state_size, fc1) + ReLU ----------------------------------
    h1 = jnp.dot(state, w1_ref[...], preferred_element_type=jnp.float32) + b1
    h1 = jnp.maximum(h1, 0.0)

    # ---- BatchNorm1d(fc1), training mode (batch stats, biased variance) ---
    mean = jnp.mean(h1, axis=0, keepdims=True)
    cent = h1 - mean
    var = jnp.mean(cent * cent, axis=0, keepdims=True)
    h1n = cent * jax.lax.rsqrt(var + 1e-5)
    h1n = h1n * gamma + beta

    # ---- Linear(fc1 + action_size, fc2) + ReLU (concat fused via split) ---
    h2 = (jnp.dot(h1n, w2h_ref[...], preferred_element_type=jnp.float32)
          + jnp.dot(action, w2a_ref[...], preferred_element_type=jnp.float32)
          + b2)
    h2 = jnp.maximum(h2, 0.0)

    # ---- Linear(fc2, 1): VPU multiply + lane reduction (no N=1 MXU push) --
    q = jnp.sum(h2 * w3_row, axis=-1, keepdims=True) + b3     # [B, 1]
    out_ref[...] = q.astype(out_ref.dtype)


def critic_forward(state, action, params):
    """state: [B, S] f32, action: [B, A] f32 -> q: [B, 1] f32."""
    (w1t, w2ht, w2at, packed) = params
    batch = state.shape[0]
    # BatchNorm1d in training mode needs batch variance > 0 rows.
    assert batch > 1, "BatchNorm1d (training) requires batch size > 1"

    fc1 = w1t.shape[1]
    fc2 = w2ht.shape[1]

    vmem_spec = pl.BlockSpec(memory_space=pltpu.MemorySpace.VMEM)
    kernel = functools.partial(_critic_kernel, fc1=fc1, fc2=fc2)

    return pl.pallas_call(
        kernel,
        out_shape=jax.ShapeDtypeStruct((batch, 1), jnp.float32),
        in_specs=[vmem_spec] * 6,
        out_specs=vmem_spec,
    )(state, action, w1t, w2ht, w2at, packed)


def xavier_uniform(key, out_features, in_features):
    # Matches torch.nn.init.xavier_uniform_ on a [out, in] weight.
    bound = jnp.sqrt(6.0 / (in_features + out_features))
    return jax.random.uniform(key, (out_features, in_features),
                              minval=-bound, maxval=bound, dtype=jnp.float32)


def init_critic_params(key, state_size, action_size, fc1_units=128, fc2_units=128):
    k1, k2, k3 = jax.random.split(key, 3)

    # Linear(state_size, fc1)
    w1 = xavier_uniform(k1, fc1_units, state_size)               # [fc1, S]
    b1 = jnp.full((fc1_units,), 0.1, dtype=jnp.float32)

    # BatchNorm1d(fc1) default init
    gamma = jnp.ones((fc1_units,), dtype=jnp.float32)
    beta = jnp.zeros((fc1_units,), dtype=jnp.float32)

    # Linear(fc1 + action_size, fc2)
    w2 = xavier_uniform(k2, fc2_units, fc1_units + action_size)  # [fc2, fc1+A]
    b2 = jnp.full((fc2_units,), 0.1, dtype=jnp.float32)
    w2h = w2[:, :fc1_units]                                      # [fc2, fc1]
    w2a = w2[:, fc1_units:]                                      # [fc2, A]

    # Linear(fc2, 1)
    w3 = xavier_uniform(k3, 1, fc2_units)                        # [1, fc2]
    b3 = jnp.float32(0.1)

    # Pack the six small parameter rows into one lane-padded [8, lane] slab.
    lane = max(fc1_units, fc2_units)
    lane = ((lane + 127) // 128) * 128
    packed = jnp.zeros((_PACK_ROWS, lane), dtype=jnp.float32)
    packed = packed.at[_ROW_B1, :fc1_units].set(b1)
    packed = packed.at[_ROW_GAMMA, :fc1_units].set(gamma)
    packed = packed.at[_ROW_BETA, :fc1_units].set(beta)
    packed = packed.at[_ROW_B2, :fc2_units].set(b2)
    packed = packed.at[_ROW_W3, :fc2_units].set(w3[0])
    packed = packed.at[_ROW_B3, 0].set(b3)

    # Pre-transpose matmul weights to [in, out] so kernel matmuls need no .T
    return (w1.T, w2h.T, w2a.T, packed)


def critic_reference(state, action, params):
    # Pure-JAX reference for sanity checking (mirrors the PyTorch module).
    (w1t, w2ht, w2at, packed) = params
    fc1 = w1t.shape[1]
    fc2 = w2ht.shape[1]
    b1 = packed[_ROW_B1, :fc1]
    gamma = packed[_ROW_GAMMA, :fc1]
    beta = packed[_ROW_BETA, :fc1]
    b2 = packed[_ROW_B2, :fc2]
    w3 = packed[_ROW_W3, :fc2]
    b3 = packed[_ROW_B3, 0]

    h1 = jnp.maximum(state @ w1t + b1, 0.0)
    mean = jnp.mean(h1, axis=0, keepdims=True)
    var = jnp.mean((h1 - mean) ** 2, axis=0, keepdims=True)
    h1n = (h1 - mean) / jnp.sqrt(var + 1e-5) * gamma + beta
    h2 = jnp.maximum(h1n @ w2ht + action @ w2at + b2, 0.0)
    return h2 @ w3[:, None] + b3


if __name__ == "__main__":
    state_size = 32
    action_size = 8
    batch = 8

    key = jax.random.PRNGKey(0)
    k_params, k_state, k_action = jax.random.split(key, 3)

    params = init_critic_params(k_params, state_size, action_size)
    state = jax.random.normal(k_state, (batch, state_size), dtype=jnp.float32)
    action = jax.random.normal(k_action, (batch, action_size), dtype=jnp.float32)

    q = critic_forward(state, action, params)
    q = jax.block_until_ready(q)

    q_ref = critic_reference(state, action, params)
    assert q.shape == (batch, 1)
    assert jnp.allclose(q, q_ref, atol=1e-4, rtol=1e-4), "mismatch vs JAX reference"

    print("KERNEL_OK")
</pallas_src>

<mosaic_0001>
module attributes {stable_mosaic.version = 11 : i64} {
  func.func @_critic_kernel(%arg0: memref<8x32xf32, #tpu.memory_space<vmem>>, %arg1: memref<8x8xf32, #tpu.memory_space<vmem>>, %arg2: memref<32x128xf32, #tpu.memory_space<vmem>>, %arg3: memref<128x128xf32, #tpu.memory_space<vmem>>, %arg4: memref<8x128xf32, #tpu.memory_space<vmem>>, %arg5: memref<8x128xf32, #tpu.memory_space<vmem>>, %arg6: memref<8x1xf32, #tpu.memory_space<vmem>>) attributes {dimension_semantics = [], scalar_prefetch = 0 : i64, scratch_operands = 0 : i64, tpu.core_type = #tpu.core_type<tc>} {
    %c0 = arith.constant 0 : index
    %c0_0 = arith.constant 0 : index
    %0 = vector.load %arg0[%c0, %c0_0] : memref<8x32xf32, #tpu.memory_space<vmem>>, vector<8x32xf32>
    %c0_1 = arith.constant 0 : index
    %c0_2 = arith.constant 0 : index
    %1 = vector.load %arg1[%c0_1, %c0_2] : memref<8x8xf32, #tpu.memory_space<vmem>>, vector<8x8xf32>
    %c0_3 = arith.constant 0 : index
    %c0_4 = arith.constant 0 : index
    %2 = vector.load %arg5[%c0_3, %c0_4] : memref<8x128xf32, #tpu.memory_space<vmem>>, vector<8x128xf32>
    %3 = vector.extract_strided_slice %2 {offsets = [0, 0], sizes = [1, 128], strides = [1, 1]} : vector<8x128xf32> to vector<1x128xf32>
    %4 = vector.extract_strided_slice %2 {offsets = [1, 0], sizes = [1, 128], strides = [1, 1]} : vector<8x128xf32> to vector<1x128xf32>
    %5 = vector.extract_strided_slice %2 {offsets = [2, 0], sizes = [1, 128], strides = [1, 1]} : vector<8x128xf32> to vector<1x128xf32>
    %6 = vector.extract_strided_slice %2 {offsets = [3, 0], sizes = [1, 128], strides = [1, 1]} : vector<8x128xf32> to vector<1x128xf32>
    %7 = vector.extract_strided_slice %2 {offsets = [4, 0], sizes = [1, 128], strides = [1, 1]} : vector<8x128xf32> to vector<1x128xf32>
    %8 = vector.extract_strided_slice %2 {offsets = [5, 0], sizes = [1, 1], strides = [1, 1]} : vector<8x128xf32> to vector<1x1xf32>
    %c0_5 = arith.constant 0 : index
    %c0_6 = arith.constant 0 : index
    %9 = vector.load %arg2[%c0_5, %c0_6] : memref<32x128xf32, #tpu.memory_space<vmem>>, vector<32x128xf32>
    %cst = arith.constant dense<0.000000e+00> : vector<8x128xf32>
    %10 = tpu.matmul %0, %9, %cst {dimension_numbers = #tpu.dot_dimension_numbers<[1], [0], [0], [1], [0, 0, 1, 1], [], []>} : vector<8x32xf32>, vector<32x128xf32>, vector<8x128xf32> -> vector<8x128xf32>
    %11 = vector.broadcast %3 : vector<1x128xf32> to vector<8x128xf32>
    %12 = arith.addf %10, %11 : vector<8x128xf32>
    %cst_7 = arith.constant 0.000000e+00 : f32
    %13 = vector.broadcast %cst_7 : f32 to vector<8x128xf32>
    %14 = arith.maximumf %12, %13 : vector<8x128xf32>
    %cst_8 = arith.constant dense<0.000000e+00> : vector<128xf32>
    %15 = vector.multi_reduction <add>, %14, %cst_8 [0] : vector<8x128xf32> to vector<128xf32>
    %16 = vector.shape_cast %15 : vector<128xf32> to vector<1x128xf32>
    %cst_9 = arith.constant 8.000000e+00 : f32
    %17 = vector.broadcast %cst_9 : f32 to vector<1x128xf32>
    %18 = arith.divf %16, %17 : vector<1x128xf32>
    %19 = vector.broadcast %18 : vector<1x128xf32> to vector<8x128xf32>
    %20 = arith.subf %14, %19 : vector<8x128xf32>
    %21 = arith.mulf %20, %20 : vector<8x128xf32>
    %cst_10 = arith.constant dense<0.000000e+00> : vector<128xf32>
    %22 = vector.multi_reduction <add>, %21, %cst_10 [0] : vector<8x128xf32> to vector<128xf32>
    %23 = vector.shape_cast %22 : vector<128xf32> to vector<1x128xf32>
    %cst_11 = arith.constant 8.000000e+00 : f32
    %24 = vector.broadcast %cst_11 : f32 to vector<1x128xf32>
    %25 = arith.divf %23, %24 : vector<1x128xf32>
    %cst_12 = arith.constant 9.99999974E-6 : f32
    %26 = vector.broadcast %cst_12 : f32 to vector<1x128xf32>
    %27 = arith.addf %25, %26 : vector<1x128xf32>
    %28 = math.rsqrt %27 : vector<1x128xf32>
    %29 = vector.broadcast %28 : vector<1x128xf32> to vector<8x128xf32>
    %30 = arith.mulf %20, %29 : vector<8x128xf32>
    %31 = vector.broadcast %4 : vector<1x128xf32> to vector<8x128xf32>
    %32 = arith.mulf %30, %31 : vector<8x128xf32>
    %33 = vector.broadcast %5 : vector<1x128xf32> to vector<8x128xf32>
    %34 = arith.addf %32, %33 : vector<8x128xf32>
    %c0_13 = arith.constant 0 : index
    %c0_14 = arith.constant 0 : index
    %35 = vector.load %arg3[%c0_13, %c0_14] : memref<128x128xf32, #tpu.memory_space<vmem>>, vector<128x128xf32>
    %cst_15 = arith.constant dense<0.000000e+00> : vector<8x128xf32>
    %36 = tpu.matmul %34, %35, %cst_15 {dimension_numbers = #tpu.dot_dimension_numbers<[1], [0], [0], [1], [0, 0, 1, 1], [], []>} : vector<8x128xf32>, vector<128x128xf32>, vector<8x128xf32> -> vector<8x128xf32>
    %c0_16 = arith.constant 0 : index
    %c0_17 = arith.constant 0 : index
    %37 = vector.load %arg4[%c0_16, %c0_17] : memref<8x128xf32, #tpu.memory_space<vmem>>, vector<8x128xf32>
    %cst_18 = arith.constant dense<0.000000e+00> : vector<8x128xf32>
    %38 = tpu.matmul %1, %37, %cst_18 {dimension_numbers = #tpu.dot_dimension_numbers<[1], [0], [0], [1], [0, 0, 1, 1], [], []>} : vector<8x8xf32>, vector<8x128xf32>, vector<8x128xf32> -> vector<8x128xf32>
    %39 = arith.addf %36, %38 : vector<8x128xf32>
    %40 = vector.broadcast %6 : vector<1x128xf32> to vector<8x128xf32>
    %41 = arith.addf %39, %40 : vector<8x128xf32>
    %cst_19 = arith.constant 0.000000e+00 : f32
    %42 = vector.broadcast %cst_19 : f32 to vector<8x128xf32>
    %43 = arith.maximumf %41, %42 : vector<8x128xf32>
    %44 = vector.broadcast %7 : vector<1x128xf32> to vector<8x128xf32>
    %45 = arith.mulf %43, %44 : vector<8x128xf32>
    %cst_20 = arith.constant dense<0.000000e+00> : vector<8xf32>
    %46 = vector.multi_reduction <add>, %45, %cst_20 [1] : vector<8x128xf32> to vector<8xf32>
    %47 = vector.shape_cast %46 : vector<8xf32> to vector<8x1xf32>
    %48 = vector.broadcast %8 : vector<1x1xf32> to vector<8x1xf32>
    %49 = arith.addf %47, %48 : vector<8x1xf32>
    %c0_21 = arith.constant 0 : index
    %c0_22 = arith.constant 0 : index
    %50 = vector.load %arg6[%c0_21, %c0_22] : memref<8x1xf32, #tpu.memory_space<vmem>>, vector<8x1xf32>
    tpu.vector_store %arg6[%c0_21, %c0_22], %49 {strides = array<i32>} : memref<8x1xf32, #tpu.memory_space<vmem>>, vector<8x1xf32>,
    return
  }
}

</mosaic_0001>

<bundles_post_ra>
// kernel: tpu_custom_call.1
= control target key start
LH: loop header
LB: loop body
LE: loop exit
PB: predicated region body
PF: predicated region fallthrough
CT: control target
= control target key end

     0   :  { %11 = vsyncpa [#allocation3], 0  ;;  %s694_s0 = inlined_call_operand.hbm [shape: f32[8,32], index: 0, kind: input, shape index: {}]   ;;  %s695_s1 = inlined_call_operand.hbm [shape: f32[8,8], index: 1, kind: input, shape index: {}]   ;;  %s696_s2 = inlined_call_operand.hbm [shape: f32[32,128], index: 2, kind: input, shape index: {}]   ;;  %s697_s3 = inlined_call_operand.hbm [shape: f32[128,128], index: 3, kind: input, shape index: {}]   ;;  %s698_s4 = inlined_call_operand.vmem [shape: f32[8,128], index: 4, kind: input, shape index: {}]   ;;  %s699_s5 = inlined_call_operand.vmem [shape: f32[8,128], index: 5, kind: input, shape index: {}]   ;;  %s700_s6 = inlined_call_operand.vmem [shape: f32[8,1], index: 6, kind: output, shape index: {}]  }
   0x1   :  { %12 = vsyncpa [#allocation5], 0 }
   0x2   :  { %13 = vsyncpa [#allocation8], 0  ;;  %s590_s21 = smov [#allocation4]   ;;  %s591_s23 = smov [#allocation2]  }
   0x3   :  { %s30_s22 = sshll.u32 %s590_s21, 4  ;;  %s20_s24 = sshll.u32 %s591_s23, 4  ;;  %s31_s22 = int_to_ptr.vmem [resolvable:$true] %s30_s22  ;;  %s21_s24 = int_to_ptr.vmem [resolvable:$true] %s20_s24 }
   0x4   :  { %s496_s27 = scalar_lea.hbm %s695_s1, 128 }
   0x5   :  { %p497_p0 = scmp.ne.s32.totalorder %s695_s1, %s496_s27  ;;  %p500_p1 = scmp.lt.u32.totalorder %s496_s27, %s695_s1 }
   0x7   :  { %p502_p2 = pnand %p500_p1, %p497_p0 }
   0x9   :  { %505 = shalt.err (!%p502_p2)
}
   0xa   :  { %s506_s8 = scalar_lea.vmem %s31_s22, 128  ;;  %p511_p4 = scmp.lt.s32.totalorder %s31_s22, %s31_s22 }
   0xb   :  { %p507_p3 = scmp.ne.s32.totalorder %s31_s22, %s506_s8  ;;  %p512_p5 = scmp.lt.s32.totalorder %s506_s8, %s506_s8 }
   0xd   :  { %p513_p6 = por %p512_p5, %p511_p4 }
   0xf   :  { %p514_p7 = pnand %p513_p6, %p507_p3 }
  0x11   :  { %517 = shalt.err (!%p514_p7)
}
  0x12   :  { %33 = dma.hbm_to_vmem [thread:$0]  %s695_s1, 128, %s31_s22, [#allocation5]  }
  0x13   :  { %s518_s13 = scalar_lea.hbm %s694_s0, 128 }
  0x14   :  { %p519_p8 = scmp.ne.s32.totalorder %s694_s0, %s518_s13  ;;  %p522_p9 = scmp.lt.u32.totalorder %s518_s13, %s694_s0 }
  0x16   :  { %p524_p10 = pnand %p522_p9, %p519_p8 }
  0x18   :  { %527 = shalt.err (!%p524_p10)
}
  0x19   :  { %s528_s18 = scalar_lea.vmem %s21_s24, 128  ;;  %p533_p12 = scmp.lt.s32.totalorder %s21_s24, %s21_s24 }
  0x1a   :  { %p529_p11 = scmp.ne.s32.totalorder %s21_s24, %s528_s18  ;;  %p534_p13 = scmp.lt.s32.totalorder %s528_s18, %s528_s18 }
  0x1c   :  { %p535_p0 = por %p534_p13, %p533_p12 }
  0x1e   :  { %p536_p1 = pnand %p535_p0, %p529_p11 }
  0x20   :  { %539 = shalt.err (!%p536_p1)
}
  0x21   :  { %23 = dma.hbm_to_vmem [thread:$0]  %s694_s0, 128, %s21_s24, [#allocation3]  }
  0x22   :  { %s592_s20 = smov [#allocation6]   ;;  %s540_s25 = scalar_lea.hbm %s696_s2, 512 }
  0x23   :  { %s39_s21 = sshll.u32 %s592_s20, 4  ;;  %p541_p2 = scmp.ne.s32.totalorder %s696_s2, %s540_s25  ;;  %s40_s21 = int_to_ptr.vmem [resolvable:$true] %s39_s21 }
  0x24   :  { %p544_p3 = scmp.lt.u32.totalorder %s540_s25, %s696_s2 }
  0x26   :  { %p546_p4 = pnand %p544_p3, %p541_p2 }
  0x28   :  { %549 = shalt.err (!%p546_p4)
}
  0x29   :  { %s550_s30 = scalar_lea.vmem %s40_s21, 512  ;;  %p555_p6 = scmp.lt.s32.totalorder %s40_s21, %s40_s21 }
  0x2a   :  { %p551_p5 = scmp.ne.s32.totalorder %s40_s21, %s550_s30  ;;  %p556_p7 = scmp.lt.s32.totalorder %s550_s30, %s550_s30 }
  0x2c   :  { %p557_p8 = por %p556_p7, %p555_p6 }
  0x2e   :  { %p558_p9 = pnand %p557_p8, %p551_p5 }
  0x30   :  { %561 = shalt.err (!%p558_p9)
}
  0x31   :  { %s593_s0 = smov 128   ;;  %s594_s24 = smov 8  }
  0x32   :  { %45 = dma.hbm_to_vmem [thread:$0]  %s696_s2, 512, %s40_s21, [#allocation5], %s593_s0, %s593_s0, %s594_s24  }
  0x33   :  { %s595_s9 = smov [#allocation7]   ;;  %s562_s13 = scalar_lea.hbm %s697_s3, 2048 }
  0x34   :  { %s51_s10 = sshll.u32 %s595_s9, 4  ;;  %p563_p10 = scmp.ne.s32.totalorder %s697_s3, %s562_s13  ;;  %s52_s10 = int_to_ptr.vmem [resolvable:$true] %s51_s10 }
  0x35   :  { %p566_p11 = scmp.lt.u32.totalorder %s562_s13, %s697_s3 }
  0x37   :  { %p568_p12 = pnand %p566_p11, %p563_p10 }
  0x39   :  { %571 = shalt.err (!%p568_p12)
}
  0x3a   :  { %s572_s18 = scalar_lea.vmem %s52_s10, 2048  ;;  %p577_p0 = scmp.lt.s32.totalorder %s52_s10, %s52_s10 }
  0x3b   :  { %p573_p13 = scmp.ne.s32.totalorder %s52_s10, %s572_s18  ;;  %p578_p1 = scmp.lt.s32.totalorder %s572_s18, %s572_s18 }
  0x3d   :  { %p579_p2 = por %p578_p1, %p577_p0 }
  0x3f   :  { %p580_p3 = pnand %p579_p2, %p573_p13 }
  0x41   :  { %583 = shalt.err (!%p580_p3)
}
  0x42   :  { %57 = dma.hbm_to_vmem [thread:$0]  %s697_s3, 2048, %s52_s10, [#allocation8], %s593_s0, %s593_s0, %s594_s24  }
  0x43   :  { %584 = dma.done.wait [#allocation3], 128  }
  0x44   :  { %585 = vsyncadd [#allocation3], 4294967168 }
  0x45   :  { %586 = dma.done.wait [#allocation5], 640  }
  0x46   :  { %587 = vsyncadd [#allocation5], 4294966656 }
  0x47   :  { %588 = dma.done.wait [#allocation8], 2048  }
  0x48   :  { %589 = vsyncadd [#allocation8], 4294965248  ;;  %v596_v0 = vmov 0.0|0.0   ;;  %vm597_vm0 = vmmov 0   ;;  %v598_v1 = vmov 0.0   ;;  %v77_v2 = vld [vmem:[#allocation6] sm:$0xff]  ;;  %v81_v35 = vlaneseq }
  0x49   :  { %455 = vmatprep.subr.bf16.mxu0 %v596_v0  ;;  %412 = vmatprep.mubr.msk.f32.mxu0 %vm597_vm0, %v598_v1  ;;  %v78_v3 = vld [vmem:[#allocation6 + $0x8] sm:$0xff]  ;;  %v79_v4 = vld [vmem:[#allocation6 + $0x10] sm:$0xff]  ;;  %v80_v6 = vld [vmem:[#allocation6 + $0x18] sm:$0xff]  ;;  %vm85_vm1 = vcmask 261120   ;;  %vm207_vm2 = vcmask 64512   ;;  %vm369_vm3 = vcmask 7168  }
  0x4a   :  { %461 = vmatprep.subr.bf16.mxu1 %v596_v0  ;;  %452 = vmatprep.mubr.msk.f32.mxu1 %vm597_vm0, %v598_v1  ;;  %v456_v5 = vpack.c.bf16 %v78_v3, %v77_v2  ;;  %v459_v7 = vpack.c.bf16 %v80_v6, %v79_v4  ;;  %v74_v8 = vld [vmem:[#allocation2] sm:$0xff]  ;;  %v190_v9 = vld [vmem:[#allocation7] sm:$0xff]  ;;  %v191_v10 = vld [vmem:[#allocation7 + $0x8] sm:$0xff]  ;;  %v82_v36 = vshrl.u32 %v81_v35, 7 }
  0x4b   :  { %v462_v11 = vpack.c.bf16 %v191_v10, %v190_v9  ;;  %v192_v12 = vld [vmem:[#allocation7 + $0x10] sm:$0xff]  ;;  %v193_v13 = vld [vmem:[#allocation7 + $0x18] sm:$0xff]  ;;  %v194_v15 = vld [vmem:[#allocation7 + $0x20] sm:$0xff] }
  0x4c   :  { %457 = vmatpush3.bf16.msra.mxu0 %v456_v5  ;;  %v465_v14 = vpack.c.bf16 %v193_v13, %v192_v12  ;;  %v195_v16 = vld [vmem:[#allocation7 + $0x28] sm:$0xff]  ;;  %v196_v18 = vld [vmem:[#allocation7 + $0x30] sm:$0xff]  ;;  %v197_v19 = vld [vmem:[#allocation7 + $0x38] sm:$0xff]  ;;  %v83_v37 = vsub.s32 0, %v82_v36  ;;  %v182_v61 = vsub.s32 1, %v82_v36  ;;  %v187_v62 = vsub.s32 2, %v82_v36 }
  0x4d   :  { %458 = vmatprep.subr.bf16.mxu0 %v596_v0  ;;  %463 = vmatpush3.bf16.msra.mxu1 %v462_v11  ;;  %v468_v17 = vpack.c.bf16 %v195_v16, %v194_v15  ;;  %v471_v20 = vpack.c.bf16 %v197_v19, %v196_v18  ;;  %v198_v21 = vld [vmem:[#allocation7 + $0x40] sm:$0xff]  ;;  %v199_v22 = vld [vmem:[#allocation7 + $0x48] sm:$0xff]  ;;  %v200_v24 = vld [vmem:[#allocation7 + $0x50] sm:$0xff]  ;;  %v359_v9 = vsub.s32 4, %v82_v36 }
  0x4e   :  { %464 = vmatprep.subr.bf16.mxu1 %v596_v0  ;;  %v474_v23 = vpack.c.bf16 %v199_v22, %v198_v21  ;;  %v201_v25 = vld [vmem:[#allocation7 + $0x58] sm:$0xff]  ;;  %v202_v27 = vld [vmem:[#allocation7 + $0x60] sm:$0xff]  ;;  %v203_v28 = vld [vmem:[#allocation7 + $0x68] sm:$0xff] }
  0x4f   :  { %v477_v26 = vpack.c.bf16 %v201_v25, %v200_v24  ;;  %v480_v29 = vpack.c.bf16 %v203_v28, %v202_v27  ;;  %v206_v30 = vld [vmem:[%s698_s4] sm:$0xff]  ;;  %v205_v32 = vld [vmem:[#allocation7 + $0x78] sm:$0xff] }
  0x50   :  { %460 = vmatpush3.bf16.msra.mxu0 %v459_v7  ;;  %v204_v31 = vld [vmem:[#allocation7 + $0x70] sm:$0xff]  ;;  %v75_v34 = vld [vmem:[#allocation4] sm:$0xff]  ;;  %v353_v7 = vsub.s32 3, %v82_v36 }
  0x51   :  { %415 = vmatprep.subr.mxu0 %v598_v1  ;;  %466 = vmatpush3.bf16.msra.mxu1 %v465_v14  ;;  %v483_v33 = vpack.c.bf16 %v205_v32, %v204_v31  ;;  %v76_v38 = vld [vmem:[%s699_s5] sm:$0xff] }
  0x52   :  { %467 = vmatprep.subr.bf16.mxu1 %v596_v0  ;;  %v84_v39 = vrot.slane %v76_v38, %v83_v37  ;;  %v183_v63 = vrot.slane %v76_v38, %v182_v61  ;;  %v188_v2 = vrot.slane %v76_v38, %v187_v62  ;;  %v360_v14 = vrot.slane %v76_v38, %v359_v9 }
  0x53   :  { %413 = vmatmul.mubr.msk.f32.vlgmr.msra.gmra.mrb[0].mxu0 %vm85_vm1, %v74_v8  ;;  %v354_v8 = vrot.slane %v76_v38, %v353_v7 }
  0x54   :  { %417 = vmatprep.mubr.msk.f32.mxu0 %vm597_vm0, %v598_v1  ;;  %416 = vmatpush3.msra.mxu0 %v206_v30 }
  0x55   :  { %469 = vmatpush3.bf16.msra.mxu1 %v468_v17  ;;  %v366_v17 = vsub.s32 5, %v82_v36 }
  0x56   :  { %470 = vmatprep.subr.bf16.mxu1 %v596_v0 }
  0x57   :  { %418 = vmatmul.mubr.msk.f32.vlgmr.msra.gmra.mrb[2].mxu0 %vm207_vm2, %v75_v34  ;;  %v367_v18 = vrot.slane %v76_v38, %v366_v17 }
  0x59   :  { %472 = vmatpush3.bf16.msra.mxu1 %v471_v20 }
  0x5a   :  { %473 = vmatprep.subr.bf16.mxu1 %v596_v0 }
  0x5d   :  { %475 = vmatpush3.bf16.msra.mxu1 %v474_v23 }
  0x5e   :  { %476 = vmatprep.subr.bf16.mxu1 %v596_v0 }
  0x61   :  { %478 = vmatpush3.bf16.msra.mxu1 %v477_v26 }
  0x62   :  { %479 = vmatprep.subr.bf16.mxu1 %v596_v0 }
  0x65   :  { %481 = vmatpush3.bf16.msra.mxu1 %v480_v29 }
  0x66   :  { %482 = vmatprep.subr.bf16.mxu1 %v596_v0 }
  0x69   :  { %484 = vmatpush3.bf16.msra.mxu1 %v483_v33 }
 0x126   :  { %v155_v40 = vpop.f32.mrb[0].mxu0 }
 0x127   :  { %v156_v41 = vadd.f32 %v155_v40, %v84_v39  ;;  %v414_v42 = vpop.f32.mrb[1].mxu0 }
 0x129   :  { %v159_v43 = vmax.f32 %v156_v41, 0.0 }
 0x12a   :  { %v277_v5 = vpop.f32.mrb[2].mxu0 }
 0x12b   :  { %v160_v44 = vrot.slane %v159_v43, 4  ;;  %v419_v6 = vpop.f32.mrb[3].mxu0 }
 0x12d   :  { %v161_v45 = vadd.f32 %v160_v44, %v159_v43 }
 0x12f   :  { %v162_v46 = vrot.slane %v161_v45, 2 }
 0x131   :  { %v163_v47 = vadd.f32 %v162_v46, %v161_v45 }
 0x133   :  { %v164_v48 = vrot.slane %v163_v47, 1 }
 0x135   :  { %v165_v49 = vadd.f32 %v164_v48, %v163_v47 }
 0x137   :  { %v167_v50 = vmul.f32 0.125, %v165_v49 }
 0x139   :  { %v168_v51 = vsub.f32 %v159_v43, %v167_v50 }
 0x13b   :  { %v169_v52 = vmul.f32 %v168_v51, %v168_v51 }
 0x13d   :  { %v170_v53 = vrot.slane %v169_v52, 4 }
 0x13f   :  { %v171_v54 = vadd.f32 %v170_v53, %v169_v52 }
 0x141   :  { %v172_v55 = vrot.slane %v171_v54, 2 }
 0x143   :  { %v173_v56 = vadd.f32 %v172_v55, %v171_v54 }
 0x145   :  { %v174_v57 = vrot.slane %v173_v56, 1 }
 0x147   :  { %v175_v58 = vadd.f32 %v174_v57, %v173_v56 }
 0x149   :  { %v176_v59 = vmul.f32 0.125, %v175_v58 }
 0x14b   :  { %v177_v60 = vadd.f32 1e-05, %v176_v59 }
 0x14d   :  { %494 = vrsqrt.f32 %v177_v60 }
 0x157   :  { %v495_v0 = vpop.eup %494 }
 0x158   :  { %v179_v1 = vmul.f32 %v495_v0, %v168_v51 }
 0x15a   :  { %v184_v3 = vmul.f32 %v183_v63, %v179_v1 }
 0x15c   :  { %v189_v4 = vadd.f32 %v188_v2, %v184_v3 }
 0x15e   :  { %453 = vmatmul.mubr.f32.vlgmr.msra.gmra.mrb[0].mxu1 %v189_v4 }
 0x231   :  { %v347_v10 = vpop.f32.mrb[0].mxu1 }
 0x232   :  { %v348_v11 = vadd.f32 %v347_v10, %v277_v5  ;;  %v454_v12 = vpop.f32.mrb[1].mxu1 }
 0x234   :  { %v355_v13 = vadd.f32 %v354_v8, %v348_v11 }
 0x236   :  { %v356_v15 = vmax.f32 %v355_v13, 0.0 }
 0x238   :  { %v361_v16 = vmul.f32 %v360_v14, %v356_v15 }
 0x23a   :  { %362 = vadd.xlane.f32.xlu0 %v361_v16 }
 0x2c7   :  { %v363_v19 = vpop.xlane.xlu0 %362 }
 0x2c8   :  { %v368_v20 = vadd.f32 %v367_v18, %v363_v19 }
 0x2ca   :  { %370 = vst.msk [vmem:[%s700_s6] sm:$0xff] %vm369_vm3, %v368_v20 }
 0x2cb   :  { %375 = vsyncpa [#allocation3], 1 }
 0x2cc   :  { %376 = vsyncpa [#allocation5], 1 }
 0x2cd   :  { %377 = vsyncpa [#allocation8], 1 }

</bundles_post_ra>
